<compile_context>
chip_gen: v6e
topology: v6e:2x2x1
jax: 0.10.0
libtpu: 0.0.40
codegen_flags: <defaults>
</compile_context>

<pallas_src>
import jax
import jax.numpy as jnp
from jax.experimental import pallas as pl
from jax.experimental.pallas import tpu as pltpu


def _round_up(x, m):
    return ((x + m - 1) // m) * m


def _vmem_caps():
    """(physical VMEM bytes, working budget for the kernel's live blocks)."""
    try:
        phys = int(pltpu.get_tpu_info().vmem_capacity_bytes)
    except Exception:
        phys = 64 << 20  # assume the smallest generation (v7x) if the query fails
    return phys, int(phys * 0.625)  # ~40 MiB on v7x, ~80 MiB on v5e/v6e


def _block_vmem_bytes(tc, tb, F, x_it, w_it, b_it, out_it):
    """Double-buffered VMEM footprint of one grid step's blocks (with layout padding)."""
    f_pad = _round_up(F, 128)
    c_pad = _round_up(tc, 8)
    return (2 * tc * _round_up(tb, 8) * f_pad * x_it      # x tile
            + 2 * c_pad * _round_up(tb, 128) * out_it     # output tile
            + 2 * c_pad * f_pad * w_it                    # weights
            + 2 * c_pad * 128 * b_it)                     # bias


def _select_tiles(C, B, F, x_it, w_it, b_it, out_it, budget):
    """Pick (tc, tb) so the double-buffered block set fits the VMEM budget."""
    f_pad = _round_up(F, 128)

    def max_tb(tc):
        c_pad = _round_up(tc, 8)
        const = 2 * c_pad * f_pad * w_it + 2 * c_pad * 128 * b_it
        per_row = 2 * tc * f_pad * x_it + 2 * c_pad * out_it
        return max((budget - const) // per_row, 0)

    # Channel tile: keep all channels in one block when C is small, otherwise an
    # 8-aligned tile; shrink it if even a 128-row batch tile would not fit.
    tc = C if C <= 64 else 64
    while tc > 8 and max_tb(tc) < 128:
        tc = max(8, _round_up(tc // 2, 8))

    tb = min(int(max_tb(tc)), 2048)  # >2048-row tiles give <1% extra HBM roofline
    if tb >= B:
        # Whole batch fits in one tile.  For large B still emit >=2 tiles so the
        # "parallel" batch axis can shard across v7x's two TensorCores.
        tb = _round_up(pl.cdiv(B, 2), 128) if B >= 1024 else B
    else:
        # Tiled batch: tb must be a multiple of 128 (lane-dense unmasked stores).
        tb = max((tb // 128) * 128, min(B, 128))
    return tc, tb


def tail_kernel(x_ref, w_ref, b_ref, o_ref):
    # x_ref: (tc, tb, F)  -- channel tile x batch tile x features
    # w_ref: (tc, F)      -- per-channel linear weights (output dim squeezed)
    # b_ref: (tc, 1)      -- per-channel bias
    # o_ref: (tc, tb)     -- lane-dense output (batch is the last dim)
    x = x_ref[...]
    w = w_ref[...].astype(x.dtype)
    # VPU multiply + XLU reduction over F (an N=1 MXU matmul would waste the MXU);
    # accumulate in f32 so bf16 inputs keep full reduction precision.
    y = jnp.sum(x * w[:, None, :], axis=-1, dtype=jnp.float32)   # (tc, tb)
    y = y + b_ref[...].astype(jnp.float32)                       # bias broadcast over batch
    o_ref[...] = y.astype(o_ref.dtype)


def tail_forward(combined_features, weight, bias, *, tb=None, tc=None, force_pallas=False):
    """combined_features: (C, B, F); weight: (C, F, 1); bias: (C, 1, 1) -> (C, B)."""
    C, B, F = combined_features.shape
    out_dtype = combined_features.dtype
    x_it = combined_features.dtype.itemsize
    out_it = jnp.dtype(out_dtype).itemsize

    # Tiny problems: a fused XLA multiply+reduce beats a pallas_call's fixed launch /
    # pipeline overhead and the masked sub-(8,128) stores of a tiny output.
    if not force_pallas and C * B * F * x_it < (1 << 21):
        return (jnp.einsum("cbf,cfo->cbo", combined_features, weight) + bias)[..., 0]

    w2 = weight.reshape(C, F)   # (C, F)  cheap XLA-side reshape of params
    b2 = bias.reshape(C, 1)     # (C, 1)
    w_it = w2.dtype.itemsize
    b_it = b2.dtype.itemsize

    phys_vmem, budget = _vmem_caps()
    sel_tc, sel_tb = _select_tiles(C, B, F, x_it, w_it, b_it, out_it, budget)
    if tc is None:
        tc = sel_tc
    if tb is None:
        tb = sel_tb

    # Ragged tails (B % tb, C % tc) are handled by Pallas: boundary blocks are padded
    # on read and out-of-bounds writes are dropped, so every real output row is written.
    grid = (pl.cdiv(C, tc), pl.cdiv(B, tb))

    footprint = _block_vmem_bytes(tc, tb, F, x_it, w_it, b_it, out_it)
    vmem_limit = int(min(max(footprint + (8 << 20), 32 << 20), phys_vmem - (4 << 20)))

    return pl.pallas_call(
        tail_kernel,
        out_shape=jax.ShapeDtypeStruct((C, B), out_dtype),
        grid=grid,
        in_specs=[
            pl.BlockSpec((tc, tb, F), lambda ci, bi: (ci, bi, 0)),  # x: tile over C and B
            pl.BlockSpec((tc, F), lambda ci, bi: (ci, 0)),          # weights: constant over bi
            pl.BlockSpec((tc, 1), lambda ci, bi: (ci, 0)),          # bias:    constant over bi
        ],
        out_specs=pl.BlockSpec((tc, tb), lambda ci, bi: (ci, bi)),  # lane-dense (B last)
        compiler_params=pltpu.CompilerParams(
            dimension_semantics=("parallel", "parallel"),
            vmem_limit_bytes=vmem_limit,
        ),
    )(combined_features, w2, b2)


if __name__ == "__main__":
    # Small shapes consistent with the module: C channels, batch B, F combined features.
    n_marginals = 4           # C
    n_combined_features = 32  # F
    batch = 8                 # B

    key = jax.random.PRNGKey(0)
    kx, kw, kb = jax.random.split(key, 3)

    x = jax.random.normal(kx, (n_marginals, batch, n_combined_features), dtype=jnp.float32)
    w = jax.random.normal(kw, (n_marginals, n_combined_features, 1), dtype=jnp.float32) * 0.1
    b = jax.random.normal(kb, (n_marginals, 1, 1), dtype=jnp.float32) * 0.1

    # Run the Pallas kernel (force it even though this problem is below the XLA cutoff).
    out = jax.block_until_ready(tail_forward(x, w, b, force_pallas=True))

    # Reference: per-channel bmm + bias, squeeze(-1).
    ref = (jnp.einsum("cbf,cfo->cbo", x, w) + b)[..., 0]
    assert out.shape == (n_marginals, batch), out.shape
    assert jnp.allclose(out, ref, atol=1e-5, rtol=1e-5), float(jnp.max(jnp.abs(out - ref)))

    # The tiny-problem XLA fallback path should match as well.
    out_small = jax.block_until_ready(tail_forward(x, w, b))
    assert jnp.allclose(out_small, ref, atol=1e-5, rtol=1e-5)

    print("KERNEL_OK")
</pallas_src>

<mosaic_0001>
module attributes {stable_mosaic.version = 11 : i64} {
  func.func @tail_kernel(%arg0: i32, %arg1: i32, %arg2: memref<4x8x32xf32, #tpu.memory_space<vmem>>, %arg3: memref<4x32xf32, #tpu.memory_space<vmem>>, %arg4: memref<4x1xf32, #tpu.memory_space<vmem>>, %arg5: memref<4x8xf32, #tpu.memory_space<vmem>>) attributes {dimension_semantics = [#tpu.dimension_semantics<parallel>, #tpu.dimension_semantics<parallel>], iteration_bounds = array<i64: 1, 1>, scalar_prefetch = 0 : i64, scratch_operands = 0 : i64, tpu.core_type = #tpu.core_type<tc>, window_params = [{transform_indices = @transform_0, window_bounds = array<i64: 4, 8, 32>}, {transform_indices = @transform_1, window_bounds = array<i64: 4, 32>}, {transform_indices = @transform_2, window_bounds = array<i64: 4, 1>}, {transform_indices = @transform_3, window_bounds = array<i64: 4, 8>}]} {
    %c0 = arith.constant 0 : index
    %c0_0 = arith.constant 0 : index
    %c0_1 = arith.constant 0 : index
    %0 = vector.load %arg2[%c0, %c0_0, %c0_1] : memref<4x8x32xf32, #tpu.memory_space<vmem>>, vector<4x8x32xf32>
    %c0_2 = arith.constant 0 : index
    %c0_3 = arith.constant 0 : index
    %1 = vector.load %arg3[%c0_2, %c0_3] : memref<4x32xf32, #tpu.memory_space<vmem>>, vector<4x32xf32>
    %2 = vector.shape_cast %1 : vector<4x32xf32> to vector<4x1x32xf32>
    %3 = vector.broadcast %2 : vector<4x1x32xf32> to vector<4x8x32xf32>
    %4 = arith.mulf %0, %3 : vector<4x8x32xf32>
    %cst = arith.constant dense<0.000000e+00> : vector<4x8xf32>
    %5 = vector.multi_reduction <add>, %4, %cst [2] : vector<4x8x32xf32> to vector<4x8xf32>
    %c0_4 = arith.constant 0 : index
    %c0_5 = arith.constant 0 : index
    %6 = vector.load %arg4[%c0_4, %c0_5] : memref<4x1xf32, #tpu.memory_space<vmem>>, vector<4x1xf32>
    %7 = vector.broadcast %6 : vector<4x1xf32> to vector<4x8xf32>
    %8 = arith.addf %5, %7 : vector<4x8xf32>
    %c0_6 = arith.constant 0 : index
    %c0_7 = arith.constant 0 : index
    %9 = vector.load %arg5[%c0_6, %c0_7] : memref<4x8xf32, #tpu.memory_space<vmem>>, vector<4x8xf32>
    tpu.vector_store %arg5[%c0_6, %c0_7], %8 {strides = array<i32>} : memref<4x8xf32, #tpu.memory_space<vmem>>, vector<4x8xf32>,
    return
  }
  func.func @transform_0(%arg0: i32, %arg1: i32) -> (i32, i32, i32) {
    %c0_i32 = arith.constant 0 : i32
    %c0_i32_0 = arith.constant 0 : i32
    return %arg0, %arg1, %c0_i32 : i32, i32, i32
  }
  func.func @transform_1(%arg0: i32, %arg1: i32) -> (i32, i32) {
    %c0_i32 = arith.constant 0 : i32
    %c0_i32_0 = arith.constant 0 : i32
    return %arg0, %c0_i32 : i32, i32
  }
  func.func @transform_2(%arg0: i32, %arg1: i32) -> (i32, i32) {
    %c0_i32 = arith.constant 0 : i32
    %c0_i32_0 = arith.constant 0 : i32
    return %arg0, %c0_i32 : i32, i32
  }
  func.func @transform_3(%arg0: i32, %arg1: i32) -> (i32, i32) {
    %c0_i32 = arith.constant 0 : i32
    return %arg0, %arg1 : i32, i32
  }
}

</mosaic_0001>

<bundles_post_ra>
// kernel: tpu_custom_call.1
= control target key start
LH: loop header
LB: loop body
LE: loop exit
PB: predicated region body
PF: predicated region fallthrough
CT: control target
= control target key end

     0   :  { %8 = vsyncpa [#allocation3], 0  ;;  %s278_s0 = inlined_call_operand.hbm [shape: f32[4,8,32], index: 0, kind: input, shape index: {}]   ;;  %s279_s1 = inlined_call_operand.vmem [shape: f32[4,32], index: 1, kind: input, shape index: {}]   ;;  %s280_s2 = inlined_call_operand.vmem [shape: f32[4,1], index: 2, kind: input, shape index: {}]   ;;  %s281_s3 = inlined_call_operand.hbm [shape: f32[4,8], index: 3, kind: output, shape index: {}]  }
   0x1   :  { %9 = vsyncpa [#allocation4], 0  ;;  %s236_s12 = smov [#allocation2]  }
   0x2   :  { %s15_s13 = sshll.u32 %s236_s12, 4  ;;  %s16_s13 = int_to_ptr.vmem [resolvable:$true] %s15_s13 }
   0x3   :  { %s200_s14 = scalar_lea.vmem %s16_s13, 512  ;;  %p205_p1 = scmp.lt.s32.totalorder %s16_s13, %s16_s13 }
   0x4   :  { %p201_p0 = scmp.ne.s32.totalorder %s16_s13, %s200_s14  ;;  %p206_p2 = scmp.lt.s32.totalorder %s200_s14, %s200_s14 }
   0x6   :  { %p207_p3 = por %p206_p2, %p205_p1 }
   0x8   :  { %p208_p4 = pnand %p207_p3, %p201_p0 }
   0xa   :  { %211 = shalt.err (!%p208_p4)
}
   0xb   :  { %s237_s15 = smov 128   ;;  %s238_s16 = smov 8  }
   0xc   :  { %21 = dma.hbm_to_vmem [thread:$0]  %s278_s0, 512, %s16_s13, [#allocation3], %s237_s15, %s237_s15, %s238_s16  }
   0xd   :  { %232 = dma.done.wait [#allocation3], 512  }
   0xe   :  { %233 = vsyncadd [#allocation3], 4294966784  ;;  %v46_v0 = vlaneseq  ;;  %v239_v1 = vmov 1966171168   ;;  %v240_v3 = vmov 0   ;;  %v29_v11 = vld [vmem:[#allocation2] sm:$0xff] }
   0xf   :  { %v44_v2 = vunpack.c.l.s4 %v239_v1  ;;  %190 = vset.pattern.permute.xlu0 %v240_v3  ;;  %191 = vset.pattern.permute.xlu1 %v240_v3  ;;  %v183_v8 = vld.sshfl [vmem:[%s279_s1] sm:$0x33 pattern:$0x75316420]  ;;  %vm83_vm0 = vcmask 261120   ;;  %v30_v15 = vld [vmem:[#allocation2 + $0x8] sm:$0xff] }
  0x10   :  { %v47_v4 = vshrl.u32 %v46_v0, 7  ;;  %v42_v9 = vcombine.high %v183_v8, %v183_v8  ;;  %v31_v16 = vld [vmem:[#allocation2 + $0x10] sm:$0xff]  ;;  %v32_v21 = vld [vmem:[#allocation2 + $0x18] sm:$0xff]  ;;  %v96_v30 = vld [vmem:[%s280_s2] sm:$0xf]  ;;  %v142_v31 = vand.u32 127, %v46_v0 }
  0x11   :  { %v45_v5 = vunpack.c.0.s8 %v44_v2  ;;  %vm159_vm1 = vcmask 1041409   ;;  %vm161_vm2 = vcmask 1042434   ;;  %s241_s2 = smov [#allocation5]   ;;  %vm163_vm3 = vcmask 1043459  }
  0x12   :  { %v61_v7 = vsub.s32 0, %v47_v4  ;;  %v145_v32 = vsub.s32 %v142_v31, %v47_v4  ;;  %v107_v35 = vsub.s32 1, %v47_v4  ;;  %v111_v38 = vsub.s32 2, %v47_v4  ;;  %s174_s21 = sshll.u32 %s241_s2, 4  ;;  %s175_s21 = int_to_ptr.vmem [resolvable:$true] %s174_s21 }
  0x13   :  { %v48_v6 = vsub.s32 %v45_v5, %v47_v4  ;;  %v115_v43 = vsub.s32 3, %v47_v4  ;;  %vm166_vm4 = vcmask 60416   ;;  %s212_s22 = scalar_lea.vmem %s175_s21, 64  ;;  %p217_p6 = scmp.lt.s32.totalorder %s175_s21, %s175_s21 }
  0x14   :  { %p213_p5 = scmp.ne.s32.totalorder %s175_s21, %s212_s22  ;;  %p218_p7 = scmp.lt.s32.totalorder %s212_s22, %s212_s22 }
  0x15   :  { %v49_v10 = vrot.slane %v183_v8, %v48_v6  ;;  %v56_v13 = vrot.slane %v42_v9, %v48_v6 }
  0x16   :  { %p219_p8 = por %p218_p7, %p217_p6 }
  0x17   :  { %v62_v12 = vrot.slane %v49_v10, %v61_v7  ;;  %v57_v14 = vcombine.high %v49_v10, %v49_v10  ;;  %v66_v18 = vrot.slane %v56_v13, %v61_v7  ;;  %v58_v20 = vcombine.high %v56_v13, %v56_v13 }
  0x18   :  { %p220_p9 = pnand %p219_p8, %p213_p5 }
  0x19   :  { %v79_v17 = vmul.f32 %v62_v12, %v29_v11  ;;  %v70_v19 = vrot.slane %v57_v14, %v61_v7  ;;  %v80_v23 = vmul.f32 %v66_v18, %v30_v15  ;;  %v74_v25 = vrot.slane %v58_v20, %v61_v7 }
  0x1b   :  { %v84_v22 = vsel %vm83_vm0, %v79_v17, 0.0  ;;  %v81_v24 = vmul.f32 %v70_v19, %v31_v16  ;;  %v87_v26 = vsel %vm83_vm0, %v80_v23, 0.0  ;;  %v82_v28 = vmul.f32 %v74_v25, %v32_v21 }
  0x1c   :  { %85 = vadd.xlane.f32.xlu0 %v84_v22 }
  0x1d   :  { %v90_v27 = vsel %vm83_vm0, %v81_v24, 0.0  ;;  %v93_v29 = vsel %vm83_vm0, %v82_v28, 0.0 }
  0x1e   :  { %91 = vadd.xlane.f32.xlu1 %v90_v27 }
  0x20   :  { %88 = vadd.xlane.f32.xlu0 %v87_v26 }
  0x22   :  { %94 = vadd.xlane.f32.xlu1 %v93_v29 }
  0x36   :  { %99 = vperm.xlu0 %190, %v96_v30  }
  0xa5   :  { %v86_v33 = vpop.xlane.xlu0 %85 }
  0xa7   :  { %v92_v41 = vpop.xlane.xlu1 %91 }
  0xa9   :  { %v89_v34 = vpop.xlane.xlu0 %88 }
  0xab   :  { %v95_v47 = vpop.xlane.xlu1 %94 }
  0xb1   :  { %v100_v36 = vpop.permute.xlu0 %99 }
  0xb2   :  { %v104_v37 = vrot.slane %v100_v36, %v61_v7  ;;  %v108_v39 = vrot.slane %v100_v36, %v107_v35  ;;  %v112_v42 = vrot.slane %v100_v36, %v111_v38  ;;  %v116_v45 = vrot.slane %v100_v36, %v115_v43 }
  0xb4   :  { %v121_v40 = vadd.f32 %v104_v37, %v86_v33  ;;  %v122_v44 = vadd.f32 %v108_v39, %v89_v34  ;;  %v123_v46 = vadd.f32 %v112_v42, %v92_v41  ;;  %v124_v48 = vadd.f32 %v116_v45, %v95_v47 }
  0xb6   :  { %130 = vperm.xlu1 %191, %v121_v40  }
  0xba   :  { %133 = vperm.xlu1 %191, %v122_v44  }
  0xbe   :  { %136 = vperm.xlu1 %191, %v123_v46  }
  0xc2   :  { %139 = vperm.xlu1 %191, %v124_v48  }
 0x131   :  { %v131_v49 = vpop.permute.xlu1 %130 }
 0x132   :  { %v146_v54 = vrot.slane %v131_v49, %v145_v32 }
 0x135   :  { %v134_v50 = vpop.permute.xlu1 %133 }
 0x136   :  { %v150_v52 = vrot.slane %v134_v50, %v145_v32 }
 0x138   :  { %v160_v56 = vsel %vm159_vm1, %v150_v52, %v146_v54 }
 0x139   :  { %v137_v51 = vpop.permute.xlu1 %136 }
 0x13a   :  { %v154_v53 = vrot.slane %v137_v51, %v145_v32 }
 0x13c   :  { %v162_v58 = vsel %vm161_vm2, %v154_v53, %v160_v56 }
 0x13d   :  { %v140_v55 = vpop.permute.xlu1 %139 }
 0x13e   :  { %v158_v57 = vrot.slane %v140_v55, %v145_v32 }
 0x140   :  { %v164_v59 = vsel %vm163_vm3, %v158_v57, %v162_v58 }
 0x141   :  { %167 = vst.msk [vmem:[#allocation5] sm:$0xf] %vm166_vm4, %v164_v59 }
 0x142   :  { %223 = shalt.err (!%p220_p9)
}
 0x143   :  { %177 = dma.vmem_to_hbm [thread:$0]  %s175_s21, 64, %s281_s3, [#allocation4]  }
 0x144   :  { %234 = dma.done.wait [#allocation4], 64  }
 0x145   :  { %235 = vsyncadd [#allocation4], 4294967232 }
 0x146   :  { %181 = vsyncpa [#allocation3], 1 }
 0x147   :  { %182 = vsyncpa [#allocation4], 1 }

</bundles_post_ra>
